<compile_context>
chip_gen: v6e
topology: v6e:2x2x1
jax: 0.10.0
libtpu: 0.0.40
codegen_flags: <defaults>
</compile_context>

<pallas_src>
import jax
import jax.numpy as jnp
import numpy as np
from jax.experimental import pallas as pl
from jax.experimental.pallas import tpu as pltpu


# ----------------------------- Fused Pallas kernel --------------------------

def _make_decoder_kernel(n_layers: int, H: int):
    def kernel(ids_ref, emb_ref, h0_ref, c0_ref, *refs):
        # Positional layout of trailing refs (inputs then outputs):
        w_refs = refs[0:n_layers]                 # layer l: [in_l + H, 4H] (cols in i,f,o,g order)
        b_refs = refs[n_layers:2 * n_layers]      # layer l: [1, 4H]
        w_fc_ref = refs[2 * n_layers]             # [H, V_pad]
        b_fc_ref = refs[2 * n_layers + 1]         # [1, V_pad]
        pred_ref = refs[2 * n_layers + 2]         # out: [B, V_pad]
        hn_ref = refs[2 * n_layers + 3]           # out: [n_layers, B, H]
        cn_ref = refs[2 * n_layers + 4]           # out: [n_layers, B, H]

        ids = ids_ref[...]                        # [B, 1] int32
        B = ids.shape[0]
        Vtab = emb_ref.shape[0]

        # Embedding lookup as one-hot matmul (MXU-friendly, no gather).
        onehot = (jax.lax.broadcasted_iota(jnp.int32, (B, Vtab), 1) == ids
                  ).astype(jnp.float32)                                   # [B, Vtab]
        x = jnp.dot(onehot, emb_ref[...],
                    preferred_element_type=jnp.float32)                   # [B, E]
        # self.dropout(...) is identity in eval / inference mode.

        for l in range(n_layers):                 # static unroll over layers
            h = h0_ref[l]                         # [B, H]
            c = c0_ref[l]                         # [B, H]
            xh = jnp.concatenate([x, h], axis=1)  # [B, in_l + H]
            gates = (jnp.dot(xh, w_refs[l][...],
                             preferred_element_type=jnp.float32)
                     + b_refs[l][...])            # [B, 4H] in (i, f, o, g) order
            sig = jax.nn.sigmoid(gates[:, :3 * H])   # one contiguous sigmoid slab
            g_g = jnp.tanh(gates[:, 3 * H:])
            i_g = sig[:, 0 * H:1 * H]
            f_g = sig[:, 1 * H:2 * H]
            o_g = sig[:, 2 * H:3 * H]
            c_new = f_g * c + i_g * g_g
            h_new = o_g * jnp.tanh(c_new)
            hn_ref[l] = h_new.astype(hn_ref.dtype)
            cn_ref[l] = c_new.astype(cn_ref.dtype)
            x = h_new                             # input to next layer

        pred_ref[...] = (jnp.dot(x, w_fc_ref[...],
                                 preferred_element_type=jnp.float32)
                         + b_fc_ref[...]).astype(pred_ref.dtype)

    return kernel


# ----------------------------- Param preparation -----------------------------

def prepare_kernel_params(params, n_layers: int, H: int, V: int):
    """Fuse / permute / pad the PyTorch-layout params for the kernel."""
    # Gate-column permutation: PyTorch order (i, f, g, o) -> kernel order (i, f, o, g).
    perm = np.concatenate([np.arange(0, H), np.arange(H, 2 * H),
                           np.arange(3 * H, 4 * H), np.arange(2 * H, 3 * H)])
    w_cat, b_cat = [], []
    for l in range(n_layers):
        w = jnp.concatenate([params["w_ih_t"][l], params["w_hh_t"][l]], axis=0)
        w_cat.append(jnp.asarray(w[:, perm]))                 # [in_l + H, 4H]
        b_cat.append(jnp.asarray(params["b"][l][:, perm]))    # [1, 4H]
    # Pad fc output dim to a full 128-lane multiple for unmasked stores.
    V_pad = ((V + 127) // 128) * 128
    w_fc_pad = jnp.zeros((H, V_pad), jnp.float32).at[:, :V].set(params["w_fc_t"])
    b_fc_pad = jnp.zeros((1, V_pad), jnp.float32).at[:, :V].set(params["b_fc"])
    return {"emb": params["emb"], "w_cat": w_cat, "b_cat": b_cat,
            "w_fc_pad": w_fc_pad, "b_fc_pad": b_fc_pad, "V": V, "V_pad": V_pad}


# ----------------------------- Decoder forward ------------------------------

def decoder_forward(kparams, token_ids, h0, c0):
    """Fused Pallas implementation of Decoder.forward (eval mode).

    token_ids: [B] int32; h0, c0: [n_layers, B, H].
    Returns (prediction [B, V], (h_n, c_n)).
    """
    n_layers, B, H = h0.shape
    V, V_pad = kparams["V"], kparams["V_pad"]

    inputs = ([token_ids.reshape(B, 1).astype(jnp.int32),
               kparams["emb"], h0, c0]
              + list(kparams["w_cat"]) + list(kparams["b_cat"])
              + [kparams["w_fc_pad"], kparams["b_fc_pad"]])

    def vmem_spec():
        return pl.BlockSpec(memory_space=pltpu.MemorySpace.VMEM)

    # TODO(synk): in an autoregressive decode loop, alias h0/c0 to h_n/c_n via
    # input_output_aliases to update LSTM state in place.
    pred_pad, h_n, c_n = pl.pallas_call(
        _make_decoder_kernel(n_layers, H),
        out_shape=(jax.ShapeDtypeStruct((B, V_pad), jnp.float32),
                   jax.ShapeDtypeStruct((n_layers, B, H), jnp.float32),
                   jax.ShapeDtypeStruct((n_layers, B, H), jnp.float32)),
        in_specs=[vmem_spec() for _ in inputs],
        out_specs=(vmem_spec(), vmem_spec(), vmem_spec()),
    )(*inputs)

    return pred_pad[:, :V], (h_n, c_n)


# ----------------------------- Pure-JAX reference ---------------------------

def decoder_reference(params, token_ids, h0, c0):
    n_layers, _, H = h0.shape
    x = jnp.take(params["emb"], token_ids, axis=0)
    hs, cs = [], []
    for l in range(n_layers):
        gates = x @ params["w_ih_t"][l] + h0[l] @ params["w_hh_t"][l] + params["b"][l]
        i = jax.nn.sigmoid(gates[:, 0 * H:1 * H])
        f = jax.nn.sigmoid(gates[:, 1 * H:2 * H])
        g = jnp.tanh(gates[:, 2 * H:3 * H])
        o = jax.nn.sigmoid(gates[:, 3 * H:4 * H])
        c = f * c0[l] + i * g
        h = o * jnp.tanh(c)
        hs.append(h)
        cs.append(c)
        x = h
    pred = x @ params["w_fc_t"] + params["b_fc"]
    return pred, (jnp.stack(hs), jnp.stack(cs))


# ----------------------------- Main ------------------------------

if __name__ == "__main__":
    # Small, module-consistent shapes.
    B = 8            # batch
    E = 32           # emb_dim
    H = 32           # hid_dim
    V = 40           # output_dim (vocab)
    N_LAYERS = 2
    DROPOUT = 0.0    # forward run in eval mode; dropout is identity.

    key = jax.random.PRNGKey(0)
    keys = jax.random.split(key, 16)

    # Deterministic parameter init (synthetic weights, PyTorch-equivalent layout,
    # stored pre-transposed so matmuls are x @ W).
    params = {
        "emb": jax.random.normal(keys[0], (V, E), jnp.float32) * 0.1,      # embedding.weight
        "w_ih_t": [],   # layer l: [E or H, 4H]   (W_ih^T, gate cols i,f,g,o)
        "w_hh_t": [],   # layer l: [H, 4H]        (W_hh^T)
        "b": [],        # layer l: [1, 4H]        (b_ih + b_hh)
        "w_fc_t": jax.random.normal(keys[1], (H, V), jnp.float32) * 0.1,   # fc_out.weight^T
        "b_fc": jax.random.normal(keys[2], (1, V), jnp.float32) * 0.1,     # fc_out.bias
    }
    for l in range(N_LAYERS):
        in_dim = E if l == 0 else H
        params["w_ih_t"].append(
            jax.random.normal(keys[3 + 3 * l], (in_dim, 4 * H), jnp.float32) * 0.1)
        params["w_hh_t"].append(
            jax.random.normal(keys[4 + 3 * l], (H, 4 * H), jnp.float32) * 0.1)
        params["b"].append(
            jax.random.normal(keys[5 + 3 * l], (1, 4 * H), jnp.float32) * 0.1)

    kparams = prepare_kernel_params(params, N_LAYERS, H, V)

    # Example inputs: token ids + encoder hidden state (h0, c0).
    token_ids = jax.random.randint(keys[12], (B,), 0, V, dtype=jnp.int32)
    h0 = jax.random.normal(keys[13], (N_LAYERS, B, H), jnp.float32)
    c0 = jax.random.normal(keys[14], (N_LAYERS, B, H), jnp.float32)

    pred, (h_n, c_n) = decoder_forward(kparams, token_ids, h0, c0)
    jax.block_until_ready((pred, h_n, c_n))

    ref_pred, (ref_h, ref_c) = decoder_reference(params, token_ids, h0, c0)
    np.testing.assert_allclose(np.asarray(pred), np.asarray(ref_pred), rtol=1e-5, atol=1e-5)
    np.testing.assert_allclose(np.asarray(h_n), np.asarray(ref_h), rtol=1e-5, atol=1e-5)
    np.testing.assert_allclose(np.asarray(c_n), np.asarray(ref_c), rtol=1e-5, atol=1e-5)

    print("KERNEL_OK")
</pallas_src>

<mosaic_0001>
module attributes {stable_mosaic.version = 11 : i64} {
  func.func @kernel(%arg0: memref<8x1xi32, #tpu.memory_space<vmem>>, %arg1: memref<40x32xf32, #tpu.memory_space<vmem>>, %arg2: memref<2x8x32xf32, #tpu.memory_space<vmem>>, %arg3: memref<2x8x32xf32, #tpu.memory_space<vmem>>, %arg4: memref<64x128xf32, #tpu.memory_space<vmem>>, %arg5: memref<64x128xf32, #tpu.memory_space<vmem>>, %arg6: memref<1x128xf32, #tpu.memory_space<vmem>>, %arg7: memref<1x128xf32, #tpu.memory_space<vmem>>, %arg8: memref<32x128xf32, #tpu.memory_space<vmem>>, %arg9: memref<1x128xf32, #tpu.memory_space<vmem>>, %arg10: memref<8x128xf32, #tpu.memory_space<vmem>>, %arg11: memref<2x8x32xf32, #tpu.memory_space<vmem>>, %arg12: memref<2x8x32xf32, #tpu.memory_space<vmem>>) attributes {dimension_semantics = [], scalar_prefetch = 0 : i64, scratch_operands = 0 : i64, tpu.core_type = #tpu.core_type<tc>} {
    %c0 = arith.constant 0 : index
    %c0_0 = arith.constant 0 : index
    %0 = vector.load %arg0[%c0, %c0_0] : memref<8x1xi32, #tpu.memory_space<vmem>>, vector<8x1xi32>
    %1 = tpu.iota {dimensions = array<i32: 1>} : vector<8x40xi32>
    %2 = vector.broadcast %0 : vector<8x1xi32> to vector<8x40xi32>
    %3 = arith.cmpi eq, %1, %2 : vector<8x40xi32>
    %4 = arith.extui %3 : vector<8x40xi1> to vector<8x40xi32>
    %5 = arith.sitofp %4 : vector<8x40xi32> to vector<8x40xf32>
    %c0_1 = arith.constant 0 : index
    %c0_2 = arith.constant 0 : index
    %6 = vector.load %arg1[%c0_1, %c0_2] : memref<40x32xf32, #tpu.memory_space<vmem>>, vector<40x32xf32>
    %cst = arith.constant dense<0.000000e+00> : vector<8x32xf32>
    %7 = tpu.matmul %5, %6, %cst {dimension_numbers = #tpu.dot_dimension_numbers<[1], [0], [0], [1], [0, 0, 1, 1], [], []>} : vector<8x40xf32>, vector<40x32xf32>, vector<8x32xf32> -> vector<8x32xf32>
    %c0_3 = arith.constant 0 : index
    %c0_4 = arith.constant 0 : index
    %c0_5 = arith.constant 0 : index
    %8 = vector.load %arg2[%c0_3, %c0_4, %c0_5] : memref<2x8x32xf32, #tpu.memory_space<vmem>>, vector<1x8x32xf32>
    %9 = vector.shape_cast %8 : vector<1x8x32xf32> to vector<8x32xf32>
    %c0_6 = arith.constant 0 : index
    %c0_7 = arith.constant 0 : index
    %c0_8 = arith.constant 0 : index
    %10 = vector.load %arg3[%c0_6, %c0_7, %c0_8] : memref<2x8x32xf32, #tpu.memory_space<vmem>>, vector<1x8x32xf32>
    %11 = vector.shape_cast %10 : vector<1x8x32xf32> to vector<8x32xf32>
    %12 = tpu.concatenate %7, %9 in 1 : vector<8x32xf32>, vector<8x32xf32> -> vector<8x64xf32>
    %c0_9 = arith.constant 0 : index
    %c0_10 = arith.constant 0 : index
    %13 = vector.load %arg4[%c0_9, %c0_10] : memref<64x128xf32, #tpu.memory_space<vmem>>, vector<64x128xf32>
    %cst_11 = arith.constant dense<0.000000e+00> : vector<8x128xf32>
    %14 = tpu.matmul %12, %13, %cst_11 {dimension_numbers = #tpu.dot_dimension_numbers<[1], [0], [0], [1], [0, 0, 1, 1], [], []>} : vector<8x64xf32>, vector<64x128xf32>, vector<8x128xf32> -> vector<8x128xf32>
    %c0_12 = arith.constant 0 : index
    %c0_13 = arith.constant 0 : index
    %15 = vector.load %arg6[%c0_12, %c0_13] : memref<1x128xf32, #tpu.memory_space<vmem>>, vector<1x128xf32>
    %16 = vector.broadcast %15 : vector<1x128xf32> to vector<8x128xf32>
    %17 = arith.addf %14, %16 : vector<8x128xf32>
    %18 = vector.extract_strided_slice %17 {offsets = [0, 0], sizes = [8, 96], strides = [1, 1]} : vector<8x128xf32> to vector<8x96xf32>
    %19 = arith.negf %18 : vector<8x96xf32>
    %20 = math.exp %19 : vector<8x96xf32>
    %cst_14 = arith.constant 1.000000e+00 : f32
    %21 = vector.broadcast %cst_14 : f32 to vector<8x96xf32>
    %22 = arith.addf %21, %20 : vector<8x96xf32>
    %23 = arith.divf %21, %22 : vector<8x96xf32>
    %24 = vector.extract_strided_slice %17 {offsets = [0, 96], sizes = [8, 32], strides = [1, 1]} : vector<8x128xf32> to vector<8x32xf32>
    %25 = math.tanh %24 : vector<8x32xf32>
    %26 = vector.extract_strided_slice %23 {offsets = [0, 0], sizes = [8, 32], strides = [1, 1]} : vector<8x96xf32> to vector<8x32xf32>
    %27 = vector.extract_strided_slice %23 {offsets = [0, 32], sizes = [8, 32], strides = [1, 1]} : vector<8x96xf32> to vector<8x32xf32>
    %28 = vector.extract_strided_slice %23 {offsets = [0, 64], sizes = [8, 32], strides = [1, 1]} : vector<8x96xf32> to vector<8x32xf32>
    %29 = arith.mulf %27, %11 : vector<8x32xf32>
    %30 = arith.mulf %26, %25 : vector<8x32xf32>
    %31 = arith.addf %29, %30 : vector<8x32xf32>
    %32 = math.tanh %31 : vector<8x32xf32>
    %33 = arith.mulf %28, %32 : vector<8x32xf32>
    %c0_15 = arith.constant 0 : index
    %c0_16 = arith.constant 0 : index
    %c0_17 = arith.constant 0 : index
    %34 = vector.load %arg11[%c0_15, %c0_16, %c0_17] : memref<2x8x32xf32, #tpu.memory_space<vmem>>, vector<1x8x32xf32>
    %35 = vector.shape_cast %34 : vector<1x8x32xf32> to vector<8x32xf32>
    %36 = vector.shape_cast %33 : vector<8x32xf32> to vector<1x8x32xf32>
    tpu.vector_store %arg11[%c0_15, %c0_16, %c0_17], %36 {strides = array<i32>} : memref<2x8x32xf32, #tpu.memory_space<vmem>>, vector<1x8x32xf32>,
    %c0_18 = arith.constant 0 : index
    %c0_19 = arith.constant 0 : index
    %c0_20 = arith.constant 0 : index
    %37 = vector.load %arg12[%c0_18, %c0_19, %c0_20] : memref<2x8x32xf32, #tpu.memory_space<vmem>>, vector<1x8x32xf32>
    %38 = vector.shape_cast %37 : vector<1x8x32xf32> to vector<8x32xf32>
    %39 = vector.shape_cast %31 : vector<8x32xf32> to vector<1x8x32xf32>
    tpu.vector_store %arg12[%c0_18, %c0_19, %c0_20], %39 {strides = array<i32>} : memref<2x8x32xf32, #tpu.memory_space<vmem>>, vector<1x8x32xf32>,
    %c1 = arith.constant 1 : index
    %c0_21 = arith.constant 0 : index
    %c0_22 = arith.constant 0 : index
    %40 = vector.load %arg2[%c1, %c0_21, %c0_22] : memref<2x8x32xf32, #tpu.memory_space<vmem>>, vector<1x8x32xf32>
    %41 = vector.shape_cast %40 : vector<1x8x32xf32> to vector<8x32xf32>
    %c1_23 = arith.constant 1 : index
    %c0_24 = arith.constant 0 : index
    %c0_25 = arith.constant 0 : index
    %42 = vector.load %arg3[%c1_23, %c0_24, %c0_25] : memref<2x8x32xf32, #tpu.memory_space<vmem>>, vector<1x8x32xf32>
    %43 = vector.shape_cast %42 : vector<1x8x32xf32> to vector<8x32xf32>
    %44 = tpu.concatenate %33, %41 in 1 : vector<8x32xf32>, vector<8x32xf32> -> vector<8x64xf32>
    %c0_26 = arith.constant 0 : index
    %c0_27 = arith.constant 0 : index
    %45 = vector.load %arg5[%c0_26, %c0_27] : memref<64x128xf32, #tpu.memory_space<vmem>>, vector<64x128xf32>
    %cst_28 = arith.constant dense<0.000000e+00> : vector<8x128xf32>
    %46 = tpu.matmul %44, %45, %cst_28 {dimension_numbers = #tpu.dot_dimension_numbers<[1], [0], [0], [1], [0, 0, 1, 1], [], []>} : vector<8x64xf32>, vector<64x128xf32>, vector<8x128xf32> -> vector<8x128xf32>
    %c0_29 = arith.constant 0 : index
    %c0_30 = arith.constant 0 : index
    %47 = vector.load %arg7[%c0_29, %c0_30] : memref<1x128xf32, #tpu.memory_space<vmem>>, vector<1x128xf32>
    %48 = vector.broadcast %47 : vector<1x128xf32> to vector<8x128xf32>
    %49 = arith.addf %46, %48 : vector<8x128xf32>
    %50 = vector.extract_strided_slice %49 {offsets = [0, 0], sizes = [8, 96], strides = [1, 1]} : vector<8x128xf32> to vector<8x96xf32>
    %51 = arith.negf %50 : vector<8x96xf32>
    %52 = math.exp %51 : vector<8x96xf32>
    %cst_31 = arith.constant 1.000000e+00 : f32
    %53 = vector.broadcast %cst_31 : f32 to vector<8x96xf32>
    %54 = arith.addf %53, %52 : vector<8x96xf32>
    %55 = arith.divf %53, %54 : vector<8x96xf32>
    %56 = vector.extract_strided_slice %49 {offsets = [0, 96], sizes = [8, 32], strides = [1, 1]} : vector<8x128xf32> to vector<8x32xf32>
    %57 = math.tanh %56 : vector<8x32xf32>
    %58 = vector.extract_strided_slice %55 {offsets = [0, 0], sizes = [8, 32], strides = [1, 1]} : vector<8x96xf32> to vector<8x32xf32>
    %59 = vector.extract_strided_slice %55 {offsets = [0, 32], sizes = [8, 32], strides = [1, 1]} : vector<8x96xf32> to vector<8x32xf32>
    %60 = vector.extract_strided_slice %55 {offsets = [0, 64], sizes = [8, 32], strides = [1, 1]} : vector<8x96xf32> to vector<8x32xf32>
    %61 = arith.mulf %59, %43 : vector<8x32xf32>
    %62 = arith.mulf %58, %57 : vector<8x32xf32>
    %63 = arith.addf %61, %62 : vector<8x32xf32>
    %64 = math.tanh %63 : vector<8x32xf32>
    %65 = arith.mulf %60, %64 : vector<8x32xf32>
    %c1_32 = arith.constant 1 : index
    %c0_33 = arith.constant 0 : index
    %c0_34 = arith.constant 0 : index
    %66 = vector.load %arg11[%c1_32, %c0_33, %c0_34] : memref<2x8x32xf32, #tpu.memory_space<vmem>>, vector<1x8x32xf32>
    %67 = vector.shape_cast %66 : vector<1x8x32xf32> to vector<8x32xf32>
    %68 = vector.shape_cast %65 : vector<8x32xf32> to vector<1x8x32xf32>
    tpu.vector_store %arg11[%c1_32, %c0_33, %c0_34], %68 {strides = array<i32>} : memref<2x8x32xf32, #tpu.memory_space<vmem>>, vector<1x8x32xf32>,
    %c1_35 = arith.constant 1 : index
    %c0_36 = arith.constant 0 : index
    %c0_37 = arith.constant 0 : index
    %69 = vector.load %arg12[%c1_35, %c0_36, %c0_37] : memref<2x8x32xf32, #tpu.memory_space<vmem>>, vector<1x8x32xf32>
    %70 = vector.shape_cast %69 : vector<1x8x32xf32> to vector<8x32xf32>
    %71 = vector.shape_cast %63 : vector<8x32xf32> to vector<1x8x32xf32>
    tpu.vector_store %arg12[%c1_35, %c0_36, %c0_37], %71 {strides = array<i32>} : memref<2x8x32xf32, #tpu.memory_space<vmem>>, vector<1x8x32xf32>,
    %c0_38 = arith.constant 0 : index
    %c0_39 = arith.constant 0 : index
    %72 = vector.load %arg8[%c0_38, %c0_39] : memref<32x128xf32, #tpu.memory_space<vmem>>, vector<32x128xf32>
    %cst_40 = arith.constant dense<0.000000e+00> : vector<8x128xf32>
    %73 = tpu.matmul %65, %72, %cst_40 {dimension_numbers = #tpu.dot_dimension_numbers<[1], [0], [0], [1], [0, 0, 1, 1], [], []>} : vector<8x32xf32>, vector<32x128xf32>, vector<8x128xf32> -> vector<8x128xf32>
    %c0_41 = arith.constant 0 : index
    %c0_42 = arith.constant 0 : index
    %74 = vector.load %arg9[%c0_41, %c0_42] : memref<1x128xf32, #tpu.memory_space<vmem>>, vector<1x128xf32>
    %75 = vector.broadcast %74 : vector<1x128xf32> to vector<8x128xf32>
    %76 = arith.addf %73, %75 : vector<8x128xf32>
    %c0_43 = arith.constant 0 : index
    %c0_44 = arith.constant 0 : index
    %77 = vector.load %arg10[%c0_43, %c0_44] : memref<8x128xf32, #tpu.memory_space<vmem>>, vector<8x128xf32>
    tpu.vector_store %arg10[%c0_43, %c0_44], %76 {strides = array<i32>} : memref<8x128xf32, #tpu.memory_space<vmem>>, vector<8x128xf32>,
    return
  }
}

</mosaic_0001>

<bundles_post_ra>
// kernel: tpu_custom_call.1
= control target key start
LH: loop header
LB: loop body
LE: loop exit
PB: predicated region body
PF: predicated region fallthrough
CT: control target
= control target key end

     0   :  { %18 = vsyncpa [#allocation3], 0  ;;  %s1061_s0 = inlined_call_operand.vmem [shape: s32[8,1], index: 0, kind: input, shape index: {}]   ;;  %s1062_s1 = inlined_call_operand.vmem [shape: f32[40,32], index: 1, kind: input, shape index: {}]   ;;  %s1063_s2 = inlined_call_operand.vmem [shape: f32[2,8,32], index: 2, kind: input, shape index: {}]   ;;  %s1064_s3 = inlined_call_operand.hbm [shape: f32[2,8,32], index: 3, kind: input, shape index: {}]   ;;  %s1065_s4 = inlined_call_operand.vmem [shape: f32[64,128], index: 4, kind: input, shape index: {}]   ;;  %s1066_s5 = inlined_call_operand.hbm [shape: f32[64,128], index: 5, kind: input, shape index: {}]   ;;  %s1067_s6 = inlined_call_operand.vmem [shape: f32[1,128], index: 6, kind: input, shape index: {}]   ;;  %s1068_s7 = inlined_call_operand.vmem [shape: f32[1,128], index: 7, kind: input, shape index: {}]   ;;  %s1069_s8 = inlined_call_operand.hbm [shape: f32[32,128], index: 8, kind: input, shape index: {}]   ;;  %s1070_s9 = inlined_call_operand.vmem [shape: f32[1,128], index: 9, kind: input, shape index: {}]   ;;  %s1071_s10 = inlined_call_operand.hbm [shape: f32[8,128], index: 10, kind: output, shape index: {0}]   ;;  %s1072_s11 = inlined_call_operand.hbm [shape: f32[2,8,32], index: 11, kind: output, shape index: {1}]   ;;  %s1073_s12 = inlined_call_operand.hbm [shape: f32[2,8,32], index: 12, kind: output, shape index: {2}]  }
   0x1   :  { %19 = vsyncpa [#allocation6], 0 }
   0x2   :  { %20 = vsyncpa [#allocation4], 0 }
   0x3   :  { %21 = vsyncpa [#allocation10], 0  ;;  %s833_s21 = smov [#allocation5]   ;;  %s834_s23 = smov [#allocation2]  }
   0x4   :  { %s47_s22 = sshll.u32 %s833_s21, 4  ;;  %s33_s24 = sshll.u32 %s834_s23, 4  ;;  %s48_s22 = int_to_ptr.vmem [resolvable:$true] %s47_s22  ;;  %s34_s24 = int_to_ptr.vmem [resolvable:$true] %s33_s24 }
   0x5   :  { %s713_s25 = scalar_lea.vmem %s48_s22, 1024  ;;  %p718_p1 = scmp.lt.s32.totalorder %s48_s22, %s48_s22 }
   0x6   :  { %p714_p0 = scmp.ne.s32.totalorder %s48_s22, %s713_s25  ;;  %p719_p2 = scmp.lt.s32.totalorder %s713_s25, %s713_s25 }
   0x8   :  { %p720_p3 = por %p719_p2, %p718_p1 }
   0xa   :  { %p721_p4 = pnand %p720_p3, %p714_p0 }
   0xc   :  { %724 = shalt.err (!%p721_p4)
}
   0xd   :  { %s835_s26 = smov 128   ;;  %s836_s27 = smov 8  }
   0xe   :  { %53 = dma.hbm_to_vmem [thread:$0]  %s1066_s5, 1024, %s48_s22, [#allocation6], %s835_s26, %s835_s26, %s836_s27  }
   0xf   :  { %s733_s30 = scalar_lea.vmem %s34_s24, 256  ;;  %p738_p6 = scmp.lt.s32.totalorder %s34_s24, %s34_s24 }
  0x10   :  { %p734_p5 = scmp.ne.s32.totalorder %s34_s24, %s733_s30  ;;  %p739_p7 = scmp.lt.s32.totalorder %s733_s30, %s733_s30 }
  0x12   :  { %p740_p8 = por %p739_p7, %p738_p6 }
  0x14   :  { %p741_p9 = pnand %p740_p8, %p734_p5 }
  0x16   :  { %744 = shalt.err (!%p741_p9)
}
  0x17   :  { %39 = dma.hbm_to_vmem [thread:$0]  %s1064_s3, 256, %s34_s24, [#allocation3], %s835_s26, %s835_s26, %s836_s27  }
  0x18   :  { %s837_s15 = smov [#allocation7]  }
  0x19   :  { %s63_s16 = sshll.u32 %s837_s15, 4  ;;  %s64_s16 = int_to_ptr.vmem [resolvable:$true] %s63_s16 }
  0x1a   :  { %s753_s17 = scalar_lea.vmem %s64_s16, 512  ;;  %p758_p11 = scmp.lt.s32.totalorder %s64_s16, %s64_s16 }
  0x1b   :  { %p754_p10 = scmp.ne.s32.totalorder %s64_s16, %s753_s17  ;;  %p759_p12 = scmp.lt.s32.totalorder %s753_s17, %s753_s17 }
  0x1d   :  { %p760_p13 = por %p759_p12, %p758_p11 }
  0x1f   :  { %p761_p0 = pnand %p760_p13, %p754_p10 }
  0x21   :  { %764 = shalt.err (!%p761_p0)
}
  0x22   :  { %69 = dma.hbm_to_vmem [thread:$0]  %s1069_s8, 512, %s64_s16, [#allocation6], %s835_s26, %s835_s26, %s836_s27  }
  0x23   :  { %825 = dma.done.wait [#allocation3], 256  }
  0x24   :  { %826 = vsyncadd [#allocation3], 4294967040 }
  0x25   :  { %827 = dma.done.wait [#allocation6], 1536  }
  0x26   :  { %828 = vsyncadd [#allocation6], 4294965760  ;;  %v838_v0 = vmov 0   ;;  %v839_v1 = vmov 0.0   ;;  %vm840_vm0 = vmmov 0   ;;  %v81_v2 = vld [vmem:[%s1061_s0] sm:$0xff]  ;;  %v82_v16 = vlaneseq }
  0x27   :  { %688 = vset.pattern.permute.xlu0 %v838_v0  ;;  %612 = vmatprep.subr.mxu0 %v839_v1  ;;  %v94_v3 = vld [vmem:[%s1062_s1 + $0x20] sm:$0xff]  ;;  %v93_v4 = vld [vmem:[%s1062_s1 + $0x18] sm:$0xff]  ;;  %v92_v5 = vld [vmem:[%s1062_s1 + $0x10] sm:$0xff]  ;;  %s841_s16 = smov 32   ;;  %vm95_vm1 = vcmask 326656   ;;  %vm175_vm3 = vcmask 261120  }
  0x28   :  { %625 = vmatprep.subr.mxu1 %v839_v1  ;;  %622 = vmatprep.mubr.msk.f32.mxu0 %vm840_vm0, %v839_v1  ;;  %v169_v6 = vld [vmem:[%s1063_s2] sm:$0xff]  ;;  %v184_v7 = vld [vmem:[%s1065_s4 + $0x38] sm:$0xff]  ;;  %v183_v8 = vld [vmem:[%s1065_s4 + $0x30] sm:$0xff]  ;;  %v83_v17 = vand.u32 127, %v82_v16  ;;  %vm192_vm4 = vcmask 523264   ;;  %s842_s30 = smov 64  }
  0x29   :  { %641 = vmatprep.mubr.msk.f32.mxu1 %vm840_vm0, %v839_v1  ;;  %85 = vperm.xlu0 %688, %v81_v2   ;;  %v91_v9 = vld [vmem:[%s1062_s1 + $0x8] sm:$0xff]  ;;  %v90_v11 = vld [vmem:[%s1062_s1] sm:$0xff]  ;;  %v180_v13 = vld [vmem:[%s1065_s4 + $0x18] sm:$0xff]  ;;  %s844_s14 = smov [#allocation9]  }
  0x2a   :  { %613 = vmatpush3.msra.mxu0 %v94_v3  ;;  %626 = vmatpush3.msra.mxu1 %v184_v7  ;;  %v182_v10 = vld [vmem:[%s1065_s4 + $0x28] sm:$0xff]  ;;  %v181_v12 = vld [vmem:[%s1065_s4 + $0x20] sm:$0xff]  ;;  %v179_v14 = vld [vmem:[%s1065_s4 + $0x10] sm:$0xff]  ;;  %s540_s15 = sshll.u32 %s844_s14, 4  ;;  %s541_s15 = int_to_ptr.vmem [resolvable:$true] %s540_s15 }
  0x2b   :  { %614 = vmatprep.subr.mxu0 %v839_v1  ;;  %627 = vmatprep.subr.mxu1 %v839_v1  ;;  %v178_v15 = vld [vmem:[%s1065_s4 + $0x8] sm:$0xff]  ;;  %v177_v20 = vld [vmem:[%s1065_s4] sm:$0xff]  ;;  %v318_v43 = vld [vmem:[#allocation5 + $0x28] sm:$0xff]  ;;  %p770_p2 = scmp.lt.s32.totalorder %s541_s15, %s541_s15 }
  0x2c   :  { %615 = vmatpush3.msra.mxu0 %v93_v4  ;;  %628 = vmatpush3.msra.mxu1 %v183_v8  ;;  %v574_v25 = vld [vmem:[%s1067_s6] ss:$0 sm:$0xff]  ;;  %v320_v41 = vld [vmem:[#allocation5 + $0x38] sm:$0xff]  ;;  %v317_v44 = vld [vmem:[#allocation5 + $0x20] sm:$0xff] }
  0x2d   :  { %616 = vmatprep.subr.mxu0 %v839_v1  ;;  %172 = vrot.lane.b32.xlu0 %v169_v6, %s841_s16  ;;  %v170_v30 = vld [vmem:[#allocation2] sm:$0xff]  ;;  %v316_v45 = vld [vmem:[#allocation5 + $0x18] sm:$0xff]  ;;  %v314_v48 = vld [vmem:[#allocation5 + $0x8] sm:$0xff] }
  0x2e   :  { %617 = vmatpush3.msra.mxu0 %v92_v5  ;;  %629 = vmatprep.subr.mxu1 %v839_v1  ;;  %v319_v42 = vld [vmem:[#allocation5 + $0x30] sm:$0xff]  ;;  %v577_v49 = vld [vmem:[%s1063_s2 + $0x8] sm:$0xff]  ;;  %v313_v50 = vld [vmem:[#allocation5] sm:$0xff] }
  0x2f   :  { %618 = vmatprep.subr.mxu0 %v839_v1  ;;  %630 = vmatpush3.msra.mxu1 %v182_v10  ;;  %v315_v46 = vld [vmem:[#allocation5 + $0x10] sm:$0xff]  ;;  %v307_v51 = vld [vmem:[#allocation2 + $0x8] sm:$0xff] }
  0x30   :  { %619 = vmatpush3.msra.mxu0 %v91_v9  ;;  %631 = vmatprep.subr.mxu1 %v839_v1  ;;  %v578_v57 = vld [vmem:[%s1068_s7] ss:$0 sm:$0xff]  ;;  %v444_v9 = vld [vmem:[#allocation7 + $0x18] sm:$0xff]  ;;  %s843_s7 = smov 96  }
  0x31   :  { %620 = vmatprep.subr.mxu0 %v839_v1  ;;  %632 = vmatpush3.msra.mxu1 %v181_v12  ;;  %v443_v10 = vld [vmem:[#allocation7 + $0x10] sm:$0xff]  ;;  %v441_v12 = vld [vmem:[#allocation7] sm:$0xff] }
  0x32   :  { %621 = vmatpush3.msra.mxu0 %v90_v11  ;;  %633 = vmatprep.subr.mxu1 %v839_v1  ;;  %v442_v11 = vld [vmem:[#allocation7 + $0x8] sm:$0xff] }
  0x33   :  { %644 = vmatprep.subr.mxu0 %v839_v1  ;;  %634 = vmatpush3.msra.mxu1 %v180_v13 }
  0x34   :  { %635 = vmatprep.subr.mxu1 %v839_v1 }
  0x35   :  { %636 = vmatpush3.msra.mxu1 %v179_v14 }
  0x36   :  { %637 = vmatprep.subr.mxu1 %v839_v1 }
  0x37   :  { %638 = vmatpush3.msra.mxu1 %v178_v15 }
  0x38   :  { %639 = vmatprep.subr.mxu1 %v839_v1 }
  0x39   :  { %640 = vmatpush3.msra.mxu1 %v177_v20 }
  0x3a   :  { %663 = vmatprep.subr.mxu1 %v839_v1 }
  0xa4   :  { %v86_v18 = vpop.permute.xlu0 %85 }
  0xa5   :  { %vm87_vm2 = vcmp.eq.s32.totalorder %v83_v17, %v86_v18 }
  0xa6   :  { %v572_v19 = vsel %vm87_vm2, 1.0, %v839_v1 }
  0xa7   :  { %623 = vmatmul.mubr.msk.f32.vlgmr.msra.gmra.mxu0 %vm95_vm1, %v572_v19 }
  0xa8   :  { %660 = vmatprep.mubr.msk.f32.mxu0 %vm840_vm0, %v839_v1  ;;  %v173_v21 = vpop.permute.xlu0 %172  ;;  %645 = vmatpush3.msra.mxu0 %v320_v41 }
  0xa9   :  { %646 = vmatprep.subr.mxu0 %v839_v1 }
  0xaa   :  { %647 = vmatpush3.msra.mxu0 %v319_v42 }
  0xab   :  { %648 = vmatprep.subr.mxu0 %v839_v1 }
  0xac   :  { %649 = vmatpush3.msra.mxu0 %v318_v43 }
  0xad   :  { %650 = vmatprep.subr.mxu0 %v839_v1 }
  0xae   :  { %651 = vmatpush3.msra.mxu0 %v317_v44 }
  0xaf   :  { %652 = vmatprep.subr.mxu0 %v839_v1 }
  0xb0   :  { %653 = vmatpush3.msra.mxu0 %v316_v45 }
  0xb1   :  { %654 = vmatprep.subr.mxu0 %v839_v1 }
  0xb2   :  { %655 = vmatpush3.msra.mxu0 %v315_v46 }
  0xb3   :  { %656 = vmatprep.subr.mxu0 %v839_v1 }
  0xb4   :  { %657 = vmatpush3.msra.mxu0 %v314_v48 }
  0xb5   :  { %658 = vmatprep.subr.mxu0 %v839_v1 }
  0xb6   :  { %659 = vmatpush3.msra.mxu0 %v313_v50 }
 0x167   :  { %v165_v22 = vpop.f32.mrf.mxu0 }
 0x168   :  { %v176_v23 = vsel %vm175_vm3, %v165_v22, %v173_v21 }
 0x169   :  { %v624_v24 = vpop.f32.mrf.mxu0  ;;  %642 = vmatmul.mubr.msk.f32.vlgmr.msra.gmra.mxu1 %vm192_vm4, %v176_v23 }
 0x16a   :  { %671 = vmatprep.mubr.msk.f32.mxu1 %vm840_vm0, %v839_v1  ;;  %664 = vmatpush3.msra.mxu1 %v444_v9 }
 0x16b   :  { %665 = vmatprep.subr.mxu1 %v839_v1 }
 0x16c   :  { %666 = vmatpush3.msra.mxu1 %v443_v10 }
 0x16d   :  { %667 = vmatprep.subr.mxu1 %v839_v1 }
 0x16e   :  { %668 = vmatpush3.msra.mxu1 %v442_v11 }
 0x16f   :  { %669 = vmatprep.subr.mxu1 %v839_v1 }
 0x170   :  { %670 = vmatpush3.msra.mxu1 %v441_v12 }
 0x229   :  { %v262_v26 = vpop.f32.mrf.mxu1 }
 0x22a   :  { %v263_v27 = vadd.f32 %v574_v25, %v262_v26 }
 0x22b   :  { %v643_v28 = vpop.f32.mrf.mxu1 }
 0x22c   :  { %689 = vtanh.f32 %v263_v27  ;;  %v576_v31 = vmul.f32 -1.442695, %v263_v27 }
 0x22e   :  { %691 = vpow2.f32 %v576_v31 }
 0x239   :  { %v690_v29 = vpop.eup %689 }
 0x23a   :  { %279 = vrot.lane.b32.xlu1 %v690_v29, %s841_s16 }
 0x23b   :  { %v692_v32 = vpop.eup %691 }
 0x23c   :  { %v269_v33 = vadd.f32 1.0, %v692_v32 }
 0x23e   :  { %274 = vrot.lane.b32.xlu1 %v170_v30, %s841_s16  ;;  %693 = vrcp.f32 %v269_v33 }
 0x24b   :  { %v694_v34 = vpop.eup %693 }
 0x2ac   :  { %v280_v35 = vpop.permute.xlu1 %279 }
 0x2ad   :  { %v282_v36 = vmul.f32 %v694_v34, %v280_v35 }
 0x2af   :  { %284 = vrot.lane.b32.xlu0 %v282_v36, %s841_s16 }
 0x2b0   :  { %v275_v37 = vpop.permute.xlu1 %274 }
 0x2b1   :  { %v277_v38 = vmul.f32 %v694_v34, %v275_v37 }
 0x321   :  { %v285_v39 = vpop.permute.xlu0 %284 }
 0x322   :  { %v1008_v40 = vadd.f32 %v285_v39, %v277_v38 }
 0x324   :  { %695 = vtanh.f32 %v1008_v40 }
 0x331   :  { %v696_v47 = vpop.eup %695 }
 0x332   :  { %290 = vrot.lane.b32.xlu1 %v696_v47, %s841_s16 }
 0x336   :  { %309 = vrot.lane.b32.xlu1 %v577_v49, %s841_s16 }
 0x33a   :  { %409 = vrot.lane.b32.xlu1 %v307_v51, %s841_s16 }
 0x3a4   :  { %v291_v52 = vpop.permute.xlu1 %290 }
 0x3a5   :  { %v293_v53 = vmul.f32 %v694_v34, %v291_v52 }
 0x3a7   :  { %295 = vrot.lane.b32.xlu0 %v293_v53, %s842_s30 }
 0x3a8   :  { %v310_v54 = vpop.permute.xlu1 %309 }
 0x3ac   :  { %v410_v5 = vpop.permute.xlu1 %409 }
 0x419   :  { %v296_v55 = vpop.permute.xlu0 %295 }
 0x41a   :  { %298 = vst.msk [vmem:[#allocation9] sm:$0xff] %vm175_vm3, %v296_v55  ;;  %v312_v56 = vsel %vm175_vm3, %v296_v55, %v310_v54 }
 0x41b   :  { %661 = vmatmul.mubr.msk.f32.vlgmr.msra.gmra.mxu0 %vm192_vm4, %v312_v56 }
 0x4db   :  { %v397_v58 = vpop.f32.mrf.mxu0 }
 0x4dc   :  { %v398_v59 = vadd.f32 %v578_v57, %v397_v58 }
 0x4dd   :  { %v662_v60 = vpop.f32.mrf.mxu0 }
 0x4de   :  { %697 = vtanh.f32 %v398_v59  ;;  %v580_v62 = vmul.f32 -1.442695, %v398_v59 }
 0x4e0   :  { %699 = vpow2.f32 %v580_v62 }
 0x4eb   :  { %v698_v61 = vpop.eup %697 }
 0x4ec   :  { %414 = vrot.lane.b32.xlu0 %v698_v61, %s841_s16 }
 0x4ed   :  { %v700_v63 = vpop.eup %699 }
 0x4ee   :  { %v404_v0 = vadd.f32 1.0, %v700_v63 }
 0x4f0   :  { %701 = vrcp.f32 %v404_v0 }
 0x4fd   :  { %v702_v2 = vpop.eup %701 }
 0x4fe   :  { %v412_v6 = vmul.f32 %v702_v2, %v410_v5 }
 0x55e   :  { %v415_v3 = vpop.permute.xlu0 %414 }
 0x55f   :  { %v417_v4 = vmul.f32 %v702_v2, %v415_v3 }
 0x561   :  { %419 = vrot.lane.b32.xlu0 %v417_v4, %s841_s16 }
 0x5d3   :  { %v420_v7 = vpop.permute.xlu0 %419 }
 0x5d4   :  { %v422_v8 = vadd.f32 %v420_v7, %v412_v6 }
 0x5d6   :  { %703 = vtanh.f32 %v422_v8 }
 0x5e3   :  { %v704_v13 = vpop.eup %703 }
 0x5e4   :  { %425 = vrot.lane.b32.xlu1 %v704_v13, %s841_s16  ;;  %s765_s16 = scalar_lea.vmem %s541_s15, 256 }
 0x5e5   :  { %p766_p1 = scmp.ne.s32.totalorder %s541_s15, %s765_s16  ;;  %p771_p3 = scmp.lt.s32.totalorder %s765_s16, %s765_s16 }
 0x5e7   :  { %p772_p4 = por %p771_p3, %p770_p2 }
 0x5e8   :  { %300 = vrot.lane.b32.xlu1 %v1008_v40, %s843_s7 }
 0x5e9   :  { %p773_p5 = pnand %p772_p4, %p766_p1 }
 0x656   :  { %v426_v14 = vpop.permute.xlu1 %425 }
 0x657   :  { %v428_v15 = vmul.f32 %v702_v2, %v426_v14 }
 0x659   :  { %430 = vrot.lane.b32.xlu0 %v428_v15, %s842_s30 }
 0x65a   :  { %v301_v16 = vpop.permute.xlu1 %300 }
 0x65b   :  { %303 = vst.msk [vmem:[#allocation11] sm:$0xff] %vm175_vm3, %v301_v16 }
 0x65d   :  { %436 = vrot.lane.b32.xlu0 %v422_v8, %s843_s7 }
 0x6cb   :  { %v431_v17 = vpop.permute.xlu0 %430 }
 0x6cc   :  { %434 = vst.msk [vmem:[#allocation9 + $0x8] sm:$0xff] %vm175_vm3, %v431_v17  ;;  %672 = vmatmul.mubr.msk.f32.vlgmr.msra.gmra.mxu1 %vm175_vm3, %v431_v17 }
 0x6cf   :  { %v437_v1 = vpop.permute.xlu0 %436 }
 0x6d0   :  { %440 = vst.msk [vmem:[#allocation11 + $0x8] sm:$0xff] %vm175_vm3, %v437_v1 }
 0x6d1   :  { %776 = shalt.err (!%p773_p5)
}
 0x6d2   :  { %546 = dma.vmem_to_hbm [thread:$0]  %s541_s15, 256, %s1072_s11, [#allocation10], %s835_s26, %s835_s26, %s836_s27  }
 0x6d3   :  { %s845_s18 = smov [#allocation11]  }
 0x6d4   :  { %s552_s3 = sshll.u32 %s845_s18, 4  ;;  %s553_s3 = int_to_ptr.vmem [resolvable:$true] %s552_s3 }
 0x6d5   :  { %s785_s8 = scalar_lea.vmem %s553_s3, 256  ;;  %p790_p7 = scmp.lt.s32.totalorder %s553_s3, %s553_s3 }
 0x6d6   :  { %p786_p6 = scmp.ne.s32.totalorder %s553_s3, %s785_s8  ;;  %p791_p8 = scmp.lt.s32.totalorder %s785_s8, %s785_s8 }
 0x6d8   :  { %p792_p9 = por %p791_p8, %p790_p7 }
 0x6da   :  { %p793_p10 = pnand %p792_p9, %p786_p6 }
 0x6dc   :  { %796 = shalt.err (!%p793_p10)
}
 0x6dd   :  { %558 = dma.vmem_to_hbm [thread:$0]  %s553_s3, 256, %s1073_s12, [#allocation10], %s835_s26, %s835_s26, %s836_s27  }
 0x6de   :  { %v581_v18 = vld [vmem:[%s1070_s9] ss:$0 sm:$0xff]  ;;  %s846_s11 = smov [#allocation8]  }
 0x6df   :  { %s531_s22 = sshll.u32 %s846_s11, 4  ;;  %s532_s22 = int_to_ptr.vmem [resolvable:$true] %s531_s22 }
 0x6e0   :  { %s805_s23 = scalar_lea.vmem %s532_s22, 128  ;;  %p810_p12 = scmp.lt.s32.totalorder %s532_s22, %s532_s22 }
 0x6e1   :  { %p806_p11 = scmp.ne.s32.totalorder %s532_s22, %s805_s23  ;;  %p811_p13 = scmp.lt.s32.totalorder %s805_s23, %s805_s23 }
 0x6e3   :  { %p812_p0 = por %p811_p13, %p810_p12 }
 0x6e5   :  { %p813_p1 = pnand %p812_p0, %p806_p11 }
 0x78c   :  { %v520_v19 = vpop.f32.mrf.mxu1 }
 0x78d   :  { %v521_v20 = vadd.f32 %v581_v18, %v520_v19 }
 0x78e   :  { %v673_v21 = vpop.f32.mrf.mxu1 }
 0x78f   :  { %524 = vst [vmem:[#allocation8] sm:$0xff] %v521_v20 }
 0x790   :  { %816 = shalt.err (!%p813_p1)
}
 0x791   :  { %534 = dma.vmem_to_hbm [thread:$0]  %s532_s22, 128, %s1071_s10, [#allocation4]  }
 0x792   :  { %829 = dma.done.wait [#allocation4], 128  }
 0x793   :  { %830 = vsyncadd [#allocation4], 4294967168 }
 0x794   :  { %831 = dma.done.wait [#allocation10], 512  }
 0x795   :  { %832 = vsyncadd [#allocation10], 4294966784 }
 0x796   :  { %568 = vsyncpa [#allocation3], 1 }
 0x797   :  { %569 = vsyncpa [#allocation6], 1 }
 0x798   :  { %570 = vsyncpa [#allocation4], 1 }
 0x799   :  { %571 = vsyncpa [#allocation10], 1 }

</bundles_post_ra>
